<compile_context>
chip_gen: v7x
topology: tpu7x:2x2x1
jax: 0.10.0
libtpu: 0.0.40
codegen_flags: <defaults>
</compile_context>

<pallas_src>
import functools

import jax
import jax.numpy as jnp
from jax.experimental import pallas as pl
from jax.experimental.pallas import tpu as pltpu


_VMEM_LIMIT = 32 * 1024 * 1024  # fits scoped VMEM on v5e/v6e/v7x


def _pick_tile(full, target, align):
    """Largest `align`-aligned divisor of `full` that is <= `target`."""
    if full <= target:
        return full
    t = (target // align) * align
    while t >= align:
        if full % t == 0:
            return t
        t -= align
    # TODO(synk): pad ragged dims instead of falling back to the full extent.
    return full


# ----------------------------- linear kernel -------------------------------

def _linear_kernel(x_ref, w_ref, b_ref, o_ref, acc_ref):
    # x_ref: (1, tl, tk), w_ref: (tk, tn), b_ref: (1, tn), o_ref: (1, tl, tn)
    k = pl.program_id(3)

    @pl.when(k == 0)
    def _():
        acc_ref[...] = jnp.zeros_like(acc_ref)

    acc_ref[...] += jnp.dot(x_ref[0], w_ref[...],
                            preferred_element_type=jnp.float32)

    @pl.when(k == pl.num_programs(3) - 1)
    def _():
        o_ref[0] = (acc_ref[...] + b_ref[...].astype(jnp.float32)
                    ).astype(o_ref.dtype)


def pallas_linear(x, w, b, *, tl=256, tn=256, tk=512):
    """y = x @ w + b with x: (B, L, Din), w: (Din, Dout), b: (Dout,)."""
    B, L, Din = x.shape
    Dout = w.shape[1]
    tl = _pick_tile(L, tl, 8)
    tn = _pick_tile(Dout, tn, 128)
    tk = _pick_tile(Din, tk, 128)
    grid = (B, L // tl, Dout // tn, Din // tk)
    b2 = b.reshape(1, Dout)

    cost = pl.CostEstimate(
        flops=int(2 * B * L * Din * Dout),
        transcendentals=0,
        bytes_accessed=int((x.size + w.size + b.size + B * L * Dout)
                           * x.dtype.itemsize),
    )
    return pl.pallas_call(
        _linear_kernel,
        out_shape=jax.ShapeDtypeStruct((B, L, Dout), x.dtype),
        grid=grid,
        in_specs=[
            pl.BlockSpec((1, tl, tk), lambda bi, li, ni, ki: (bi, li, ki)),
            pl.BlockSpec((tk, tn),    lambda bi, li, ni, ki: (ki, ni)),
            pl.BlockSpec((1, tn),     lambda bi, li, ni, ki: (0, ni)),
        ],
        out_specs=pl.BlockSpec((1, tl, tn), lambda bi, li, ni, ki: (bi, li, ni)),
        scratch_shapes=[pltpu.VMEM((tl, tn), jnp.float32)],
        compiler_params=pltpu.CompilerParams(
            dimension_semantics=("parallel", "parallel", "parallel", "arbitrary"),
            vmem_limit_bytes=_VMEM_LIMIT),
        cost_estimate=cost,
    )(x, w, b2)


# --------------------------- flash attention kernel -------------------------

def _flash_attn_kernel(q_ref, k_ref, v_ref, o_ref, m_ref, l_ref, acc_ref, *,
                       scale, group, head_dim):
    # q_ref: (1, tq, G*Dh); k_ref/v_ref: (1, tkv, G*Dh); o_ref: (1, tq, G*Dh)
    # scratch: m_ref/l_ref (G, tq, 1) f32, acc_ref (G, tq, Dh) f32
    kv = pl.program_id(3)

    @pl.when(kv == 0)
    def _():
        m_ref[...] = jnp.full_like(m_ref, -jnp.inf)
        l_ref[...] = jnp.zeros_like(l_ref)
        acc_ref[...] = jnp.zeros_like(acc_ref)

    q = q_ref[0] * scale  # (tq,  G*Dh) — native dtype, feeds the MXU directly
    k = k_ref[0]          # (tkv, G*Dh)
    v = v_ref[0]          # (tkv, G*Dh)

    for h in range(group):                       # static unroll over head group
        if group == 1:
            q_h, k_h, v_h = q, k, v
        else:
            lo, hi = h * head_dim, (h + 1) * head_dim
            q_h = q[:, lo:hi]
            k_h = k[:, lo:hi]
            v_h = v[:, lo:hi]
        # Contract the Dh axes directly — no in-kernel transpose of K.
        s = jax.lax.dot_general(
            q_h, k_h, (((1,), (1,)), ((), ())),
            preferred_element_type=jnp.float32)                  # (tq, tkv)
        m_old = m_ref[h]                                         # (tq, 1)
        m_new = jnp.maximum(m_old, s.max(axis=-1, keepdims=True))
        alpha = jnp.exp(m_old - m_new)
        p = jnp.exp(s - m_new)                                   # (tq, tkv) f32
        l_ref[h] = alpha * l_ref[h] + p.sum(axis=-1, keepdims=True)
        acc_ref[h] = alpha * acc_ref[h] + jnp.dot(
            p.astype(v_h.dtype), v_h, preferred_element_type=jnp.float32)
        m_ref[h] = m_new

    @pl.when(kv == pl.num_programs(3) - 1)
    def _():
        outs = []
        for h in range(group):
            # Deferred normalization: EUP reciprocal (+1 Newton step for f32
            # accuracy), then one multiply per output element.
            l_h = l_ref[h]
            r = pl.reciprocal(l_h, approx=True)
            r = r * (2.0 - l_h * r)
            outs.append((acc_ref[h] * r).astype(o_ref.dtype))
        # Single lane-dense store of the whole (tq, G*Dh) slab.
        if group == 1:
            o_ref[0] = outs[0]
        else:
            o_ref[0] = jnp.concatenate(outs, axis=-1)


def pallas_joint_attention(qkv, num_heads, head_dim):
    """softmax(q kᵀ / sqrt(Dh)) v, reading q/k/v from flat (B, L, 3*H*Dh) QKV.

    Returns the attention output already in (B, L, H*Dh) layout (head-major,
    Dh-minor), i.e. what torch gets after .transpose(1,2).reshape(...).
    """
    B, L, C = qkv.shape
    dim = num_heads * head_dim
    assert C == 3 * dim

    # Head-group size: smallest divisor of H making G*Dh a multiple of 128.
    group = None
    for g in range(1, num_heads + 1):
        if num_heads % g == 0 and (g * head_dim) % 128 == 0:
            group = g
            break
    if group is None:
        # TODO(synk): pad head_dim so the head-group lane width hits 128.
        group = num_heads
    n_groups = num_heads // group
    gd = group * head_dim

    tq = _pick_tile(L, 256, 8)
    tkv = _pick_tile(L, 256, 8)
    grid = (B, n_groups, L // tq, L // tkv)

    scale = 1.0 / float(head_dim) ** 0.5
    kern = functools.partial(_flash_attn_kernel, scale=scale,
                             group=group, head_dim=head_dim)

    cost = pl.CostEstimate(
        flops=int(4 * B * num_heads * L * L * head_dim),
        transcendentals=int(B * num_heads * L * L),
        bytes_accessed=int((qkv.size + B * L * dim) * qkv.dtype.itemsize),
    )

    return pl.pallas_call(
        kern,
        out_shape=jax.ShapeDtypeStruct((B, L, dim), qkv.dtype),
        grid=grid,
        in_specs=[
            # q / k / v head-group slices of the flat QKV tensor (Q block
            # indices 0..n_groups-1, then K, then V — matches the torch
            # view(B, L, 3H, Dh).transpose(1, 2).chunk(3) layout).
            pl.BlockSpec((1, tq, gd),
                         lambda b, hg, qi, kv: (b, qi, hg)),
            pl.BlockSpec((1, tkv, gd),
                         lambda b, hg, qi, kv: (b, kv, n_groups + hg)),
            pl.BlockSpec((1, tkv, gd),
                         lambda b, hg, qi, kv: (b, kv, 2 * n_groups + hg)),
        ],
        out_specs=pl.BlockSpec((1, tq, gd),
                               lambda b, hg, qi, kv: (b, qi, hg)),
        scratch_shapes=[
            pltpu.VMEM((group, tq, 1), jnp.float32),          # running max m
            pltpu.VMEM((group, tq, 1), jnp.float32),          # running sum l
            pltpu.VMEM((group, tq, head_dim), jnp.float32),   # running acc
        ],
        compiler_params=pltpu.CompilerParams(
            dimension_semantics=("parallel", "parallel", "parallel", "arbitrary"),
            vmem_limit_bytes=_VMEM_LIMIT),
        cost_estimate=cost,
    )(qkv, qkv, qkv)


# ------------------------- JointAttention forward --------------------------

def joint_attention_forward(params, hidden_states_a, hidden_states_b,
                            num_heads, head_dim, only_out_a=False):
    B, La, _ = hidden_states_a.shape

    # QKV projections (tiled Pallas matmuls), then joint concat along seq.
    qkv_a = pallas_linear(hidden_states_a, params["a_to_qkv_w"], params["a_to_qkv_b"])
    qkv_b = pallas_linear(hidden_states_b, params["b_to_qkv_w"], params["b_to_qkv_b"])
    qkv = jnp.concatenate([qkv_a, qkv_b], axis=1)          # (B, L, 3*H*Dh)

    # Flash attention reads q/k/v straight out of `qkv` via BlockSpec index
    # maps and writes the (B, L, H*Dh) layout directly — no head reshape /
    # transpose round-trips through HBM.
    o = pallas_joint_attention(qkv, num_heads, head_dim)    # (B, L, H*Dh)

    o_a, o_b = o[:, :La], o[:, La:]
    out_a = pallas_linear(o_a, params["a_to_out_w"], params["a_to_out_b"])
    if only_out_a:
        return out_a
    out_b = pallas_linear(o_b, params["b_to_out_w"], params["b_to_out_b"])
    return out_a, out_b


# ------------------------------ pure-JAX ref --------------------------------

def joint_attention_reference(params, a, b, num_heads, head_dim, only_out_a=False):
    B, La, _ = a.shape
    qkv_a = a @ params["a_to_qkv_w"] + params["a_to_qkv_b"]
    qkv_b = b @ params["b_to_qkv_w"] + params["b_to_qkv_b"]
    qkv = jnp.concatenate([qkv_a, qkv_b], axis=1)
    L = qkv.shape[1]
    qkv = qkv.reshape(B, L, 3 * num_heads, head_dim).transpose(0, 2, 1, 3)
    q, k, v = (qkv[:, :num_heads], qkv[:, num_heads:2 * num_heads],
               qkv[:, 2 * num_heads:])
    s = jnp.einsum("bhqd,bhkd->bhqk", q, k) / jnp.sqrt(jnp.float32(head_dim))
    p = jax.nn.softmax(s, axis=-1)
    o = jnp.einsum("bhqk,bhkd->bhqd", p, v)
    o = o.transpose(0, 2, 1, 3).reshape(B, L, num_heads * head_dim)
    out_a = o[:, :La] @ params["a_to_out_w"] + params["a_to_out_b"]
    if only_out_a:
        return out_a
    out_b = o[:, La:] @ params["b_to_out_w"] + params["b_to_out_b"]
    return out_a, out_b


# ---------------------------------- main ------------------------------------

if __name__ == "__main__":
    # Small, module-consistent shapes: dim_a == dim_b == num_heads * head_dim.
    B = 2
    num_heads = 2
    head_dim = 64
    dim_a = dim_b = num_heads * head_dim  # 128
    La, Lb = 8, 8
    dtype = jnp.float32

    key = jax.random.PRNGKey(0)
    ks = jax.random.split(key, 10)

    def init_w(k, din, dout):
        return (jax.random.normal(k, (din, dout), dtype=jnp.float32) * 0.05).astype(dtype)

    def init_b(k, dout):
        return (jax.random.normal(k, (dout,), dtype=jnp.float32) * 0.05).astype(dtype)

    params = {
        "a_to_qkv_w": init_w(ks[0], dim_a, 3 * dim_a),
        "a_to_qkv_b": init_b(ks[1], 3 * dim_a),
        "b_to_qkv_w": init_w(ks[2], dim_b, 3 * dim_b),
        "b_to_qkv_b": init_b(ks[3], 3 * dim_b),
        "a_to_out_w": init_w(ks[4], dim_a, dim_a),
        "a_to_out_b": init_b(ks[5], dim_a),
        "b_to_out_w": init_w(ks[6], dim_b, dim_b),
        "b_to_out_b": init_b(ks[7], dim_b),
    }

    hidden_states_a = jax.random.normal(ks[8], (B, La, dim_a), dtype=jnp.float32).astype(dtype)
    hidden_states_b = jax.random.normal(ks[9], (B, Lb, dim_b), dtype=jnp.float32).astype(dtype)

    out_a, out_b = joint_attention_forward(
        params, hidden_states_a, hidden_states_b, num_heads, head_dim)
    out_a = jax.block_until_ready(out_a)
    out_b = jax.block_until_ready(out_b)

    ref_a, ref_b = joint_attention_reference(
        params, hidden_states_a, hidden_states_b, num_heads, head_dim)

    assert out_a.shape == (B, La, dim_a) and out_b.shape == (B, Lb, dim_b)
    assert jnp.allclose(out_a, ref_a, atol=1e-3, rtol=1e-3), (
        float(jnp.max(jnp.abs(out_a - ref_a))))
    assert jnp.allclose(out_b, ref_b, atol=1e-3, rtol=1e-3), (
        float(jnp.max(jnp.abs(out_b - ref_b))))

    print("KERNEL_OK")
</pallas_src>

<mosaic_0001>
module attributes {stable_mosaic.version = 11 : i64} {
  func.func @_linear_kernel(%arg0: i32, %arg1: i32, %arg2: i32, %arg3: i32, %arg4: memref<1x8x128xf32, #tpu.memory_space<vmem>>, %arg5: memref<128x128xf32, #tpu.memory_space<vmem>>, %arg6: memref<1x128xf32, #tpu.memory_space<vmem>>, %arg7: memref<1x8x128xf32, #tpu.memory_space<vmem>>, %arg8: memref<8x128xf32, #tpu.memory_space<vmem>>) attributes {dimension_semantics = [#tpu.dimension_semantics<parallel>, #tpu.dimension_semantics<parallel>, #tpu.dimension_semantics<parallel>, #tpu.dimension_semantics<arbitrary>], iteration_bounds = array<i64: 2, 1, 3, 1>, scalar_prefetch = 0 : i64, scratch_operands = 1 : i64, tpu.core_type = #tpu.core_type<tc>, window_params = [{transform_indices = @transform_0, window_bounds = array<i64: 1, 8, 128>}, {transform_indices = @transform_1, window_bounds = array<i64: 128, 128>}, {transform_indices = @transform_2, window_bounds = array<i64: 1, 128>}, {transform_indices = @transform_3, window_bounds = array<i64: 1, 8, 128>}]} {
    %c0_i32 = arith.constant 0 : i32
    %0 = arith.cmpi eq, %arg3, %c0_i32 : i32
    %1 = arith.extui %0 : i1 to i32
    %c0_i32_0 = arith.constant 0 : i32
    %2 = arith.cmpi ne, %1, %c0_i32_0 : i32
    scf.if %2 {
      %cst_11 = arith.constant 0.000000e+00 : f32
      %13 = vector.broadcast %cst_11 : f32 to vector<8x128xf32>
      %c0_12 = arith.constant 0 : index
      %c0_13 = arith.constant 0 : index
      %14 = vector.load %arg8[%c0_12, %c0_13] : memref<8x128xf32, #tpu.memory_space<vmem>>, vector<8x128xf32>
      tpu.vector_store %arg8[%c0_12, %c0_13], %13 {strides = array<i32>} : memref<8x128xf32, #tpu.memory_space<vmem>>, vector<8x128xf32>,
    } else {
    }
    %c0 = arith.constant 0 : index
    %c0_1 = arith.constant 0 : index
    %3 = vector.load %arg8[%c0, %c0_1] : memref<8x128xf32, #tpu.memory_space<vmem>>, vector<8x128xf32>
    %c0_2 = arith.constant 0 : index
    %c0_3 = arith.constant 0 : index
    %c0_4 = arith.constant 0 : index
    %4 = vector.load %arg4[%c0_2, %c0_3, %c0_4] : memref<1x8x128xf32, #tpu.memory_space<vmem>>, vector<1x8x128xf32>
    %5 = vector.shape_cast %4 : vector<1x8x128xf32> to vector<8x128xf32>
    %c0_5 = arith.constant 0 : index
    %c0_6 = arith.constant 0 : index
    %6 = vector.load %arg5[%c0_5, %c0_6] : memref<128x128xf32, #tpu.memory_space<vmem>>, vector<128x128xf32>
    %cst = arith.constant dense<0.000000e+00> : vector<8x128xf32>
    %7 = tpu.matmul %5, %6, %cst {dimension_numbers = #tpu.dot_dimension_numbers<[1], [0], [0], [1], [0, 0, 1, 1], [], []>} : vector<8x128xf32>, vector<128x128xf32>, vector<8x128xf32> -> vector<8x128xf32>
    %8 = arith.addf %3, %7 : vector<8x128xf32>
    %c0_7 = arith.constant 0 : index
    %c0_8 = arith.constant 0 : index
    %9 = vector.load %arg8[%c0_7, %c0_8] : memref<8x128xf32, #tpu.memory_space<vmem>>, vector<8x128xf32>
    tpu.vector_store %arg8[%c0_7, %c0_8], %8 {strides = array<i32>} : memref<8x128xf32, #tpu.memory_space<vmem>>, vector<8x128xf32>,
    %c0_i32_9 = arith.constant 0 : i32
    %10 = arith.cmpi eq, %arg3, %c0_i32_9 : i32
    %11 = arith.extui %10 : i1 to i32
    %c0_i32_10 = arith.constant 0 : i32
    %12 = arith.cmpi ne, %11, %c0_i32_10 : i32
    scf.if %12 {
      %c0_11 = arith.constant 0 : index
      %c0_12 = arith.constant 0 : index
      %13 = vector.load %arg8[%c0_11, %c0_12] : memref<8x128xf32, #tpu.memory_space<vmem>>, vector<8x128xf32>
      %c0_13 = arith.constant 0 : index
      %c0_14 = arith.constant 0 : index
      %14 = vector.load %arg6[%c0_13, %c0_14] : memref<1x128xf32, #tpu.memory_space<vmem>>, vector<1x128xf32>
      %15 = vector.broadcast %14 : vector<1x128xf32> to vector<8x128xf32>
      %16 = arith.addf %13, %15 : vector<8x128xf32>
      %c0_15 = arith.constant 0 : index
      %c0_16 = arith.constant 0 : index
      %c0_17 = arith.constant 0 : index
      %17 = vector.load %arg7[%c0_15, %c0_16, %c0_17] : memref<1x8x128xf32, #tpu.memory_space<vmem>>, vector<1x8x128xf32>
      %18 = vector.shape_cast %17 : vector<1x8x128xf32> to vector<8x128xf32>
      %19 = vector.shape_cast %16 : vector<8x128xf32> to vector<1x8x128xf32>
      tpu.vector_store %arg7[%c0_15, %c0_16, %c0_17], %19 {strides = array<i32>} : memref<1x8x128xf32, #tpu.memory_space<vmem>>, vector<1x8x128xf32>,
    } else {
    }
    return
  }
  func.func @transform_0(%arg0: i32, %arg1: i32, %arg2: i32, %arg3: i32) -> (i32, i32, i32) {
    %c0_i32 = arith.constant 0 : i32
    return %arg0, %arg1, %arg3 : i32, i32, i32
  }
  func.func @transform_1(%arg0: i32, %arg1: i32, %arg2: i32, %arg3: i32) -> (i32, i32) {
    %c0_i32 = arith.constant 0 : i32
    return %arg3, %arg2 : i32, i32
  }
  func.func @transform_2(%arg0: i32, %arg1: i32, %arg2: i32, %arg3: i32) -> (i32, i32) {
    %c0_i32 = arith.constant 0 : i32
    %c0_i32_0 = arith.constant 0 : i32
    return %c0_i32, %arg2 : i32, i32
  }
  func.func @transform_3(%arg0: i32, %arg1: i32, %arg2: i32, %arg3: i32) -> (i32, i32, i32) {
    %c0_i32 = arith.constant 0 : i32
    return %arg0, %arg1, %arg2 : i32, i32, i32
  }
}

</mosaic_0001>

<bundles_post_ra>
// kernel: tpu_custom_call.1
= control target key start
LH: loop header
LB: loop body
LE: loop exit
PB: predicated region body
PF: predicated region fallthrough
CT: control target
= control target key end

     0   :  { %s1370_s0 = inlined_call_operand.hbm [shape: f32[2,8,128], index: 0, kind: input, shape index: {}]   ;;  %s1371_s1 = inlined_call_operand.hbm [shape: f32[128,384], index: 1, kind: input, shape index: {}]   ;;  %s1372_s2 = inlined_call_operand.vmem [shape: f32[1,384], index: 2, kind: input, shape index: {}]   ;;  %s1373_s3 = inlined_call_operand.hbm [shape: f32[2,8,384], index: 3, kind: output, shape index: {}]  }
   0x1   :  { %1382 = sst [smem:[#allocation19_spill]] %s1370_s0 }
   0x2   :  { %8 = vsyncpa [#allocation4], 0 }
   0x3   :  { %10 = vsyncpa [#allocation4 + $0x1], 0 }
   0x4   :  { %11 = vsyncpa [#allocation7], 0 }
   0x5   :  { %13 = vsyncpa [#allocation7 + $0x1], 0 }
   0x6   :  { %14 = vsyncpa [#allocation5], 0 }
   0x7   :  { %16 = vsyncpa [#allocation5 + $0x1], 0  ;;  %s1006_s12 = smov 0   ;;  %s1008_s13 = smov 0  }
   0x8   :  { %s1010_s14 = smov 0   ;;  %s1012_s15 = smov 0  }
   0x9   :  { %s1014_s16 = smov 0   ;;  %s1016_s17 = smov 0  }
   0xa   :  { %s1018_s18 = smov 0   ;;  %s1020_s19 = smov 0  }
   0xb   :  { %s1022_s20 = smov 0   ;;  %s1024_s21 = smov 0  }
   0xc   :  { %s1026_s22 = smov 0   ;;  %s1028_s23 = smov 0  }
   0xd   :  { %s1030_s24 = smov 0   ;;  %s1032_s25 = smov 0  }
   0xe LB: > { %1383 = sst [smem:[#allocation12_spill]] %s967_s23  ;;  %s1374_s26 = sadd.s32 4294967295, %s975_s25   ;;  %s975_s25 = sphi %s1032_s25, %s22_s25   ;;  %s971_s24 = sphi %s1030_s24, %s1416_s24   ;;  %s967_s23 = sphi %s1028_s23, %s1415_s23   ;;  %s963_s22 = sphi %s1026_s22, %s1414_s22   ;;  %s959_s21 = sphi %s1024_s21, %s1413_s21   ;;  %s955_s20 = sphi %s1022_s20, %s1426_s20   ;;  %s951_s19 = sphi %s1020_s19, %s1425_s19   ;;  %s947_s18 = sphi %s1018_s18, %s1424_s18   ;;  %s943_s17 = sphi %s1016_s17, %s1423_s17   ;;  %s939_s16 = sphi %s1014_s16, %s1422_s16   ;;  %s935_s15 = sphi %s1012_s15, %s1421_s15   ;;  %s931_s14 = sphi %s1010_s14, %s1420_s14   ;;  %s927_s13 = sphi %s1008_s13, %s1419_s13   ;;  %s923_s12 = sphi %s1006_s12, %s1418_s12  }
   0xf   : > { %1384 = sst [smem:[#allocation13_spill]] %s971_s24  ;;  %s40_s28 = sadd.s32 1, %s967_s23 }
  0x10   : > { %s48_s29 = sadd.s32 1, %s971_s24  ;;  %p42_p0 = scmp.ge.s32.totalorder %s40_s28, 3 }
  0x11   : > { %s59_s30 = sadd.s32 1, %s955_s20  ;;  %p66_p1 = scmp.ne.s32.totalorder %s955_s20, %s951_s19 }
  0x12   : > { %p67_p2 = scmp.eq.s32.totalorder %s975_s25, 0  ;;  %s1428_s28 = smov (%p42_p0, %s40_s28), 0 }
  0x13   : > { %1385 = sst [smem:[#allocation14_spill]] %s1428_s28  ;;  %s1430_s29 = smov (!%p42_p0, %s48_s29), %s971_s24 }
  0x14   : > { %p1087_p3 = por %p67_p2, %p66_p1  ;;  %p72_p4 = scmp.ne.s32.totalorder %s951_s19, %s947_s18 }
  0x15   : > { %p50_p5 = scmp.ge.s32.totalorder %s1430_s29, 2  ;;  %p1094_p6 = scmp.eq.s32.totalorder %s1374_s26, 0 }
  0x16   : > { %s83_s6 = ssub.s32 %s967_s23, %s1428_s28  ;;  %s87_s7 = sadd.s32 1, %s943_s17 }
  0x17   : > { %s1432_s29 = smov (%p50_p5, %s1430_s29), 0  ;;  %p1105_p7 = por %p1094_p6, %p72_p4 }
  0x18   : > { %1388 = sst [smem:[#allocation15_spill]] %s1432_s29  ;;  %p85_p8 = scmp.eq.s32.totalorder %s83_s6, 0 }
  0x19   : > { %s1389_s8 = scalar_select %p1105_p7, 1, 0 }
  0x1a   : > { %s52_s9 = ssub.s32 %s971_s24, %s1432_s29  ;;  %p94_p9 = scmp.ne.s32.totalorder %s943_s17, %s939_s16 }
  0x1b   : > { %p57_p10 = scmp.eq.s32.totalorder %s52_s9, 0  ;;  %p100_p11 = scmp.ne.s32.totalorder %s939_s16, %s935_s15 }
  0x1c   : > { %s1116_s10 = scalar_select %p85_p8, %s943_s17, %s87_s7  }
  0x1d   : > { %s1119_s11 = scalar_select %p57_p10, %s955_s20, %s59_s30  }
  0x1e   : > { %1390 = sst [smem:[#allocation16_spill]] %s1116_s10  ;;  %p1123_p12 = por %p94_p9, %p67_p2 }
  0x1f   : > { %1391 = sst [smem:[#allocation17_spill]] %s1119_s11  ;;  %p1129_p13 = por %p100_p11, %p1094_p6 }
  0x20   : > { %s140_s26 = sor.u32 %s83_s6, %s52_s9  ;;  %s143_s29 = sadd.s32 1, %s931_s14 }
  0x21   : > { %s1393_s27 = scalar_select %p1129_p13, 1, 0 }
  0x22   : > { %p141_p0 = scmp.eq.s32.totalorder %s140_s26, 0  ;;  %p153_p1 = scmp.ne.s32.totalorder %s931_s14, %s927_s13 }
  0x23   : > { %s1394_s15 = sadd.s32 4294967295, %s975_s25   ;;  %p159_p5 = scmp.ne.s32.totalorder %s927_s13, %s923_s12 }
  0x24   : > { %p154_p4 = scmp.eq.s32.totalorder %s1394_s15, 5  ;;  %s1397_s5 = sadd.s32 4294967294, %s975_s25  }
  0x25   : > { %s1141_s30 = scalar_select %p141_p0, %s931_s14, %s143_s29  }
  0x26   : > { %p1143_p2 = por %p154_p4, %p153_p1  ;;  %p160_p6 = scmp.eq.s32.totalorder %s1397_s5, 5 }
  0x27   : > { %1395 = sst [smem:[#allocation18_spill]] %s1141_s30  ;;  %p645_p8 = scmp.lt.s32.totalorder %s975_s25, 6 }
  0x28   : > { %s1396_s7 = scalar_select %p1143_p2, 1, 0 }
  0x29   : > { %p1150_p9 = por %p160_p6, %p159_p5  ;;  %s180_s26 = sand.u32 1, %s955_s20  }
  0x2a   : > { %s538_s9 = sshll.u32 %s180_s26, 3  ;;  %s539_s28 = sshll.u32 %s971_s24, 7 }
  0x2b   : > { %s1398_s6 = scalar_select %p1150_p9, 1, 0 }
  0x2c   : > { %s1399_s0 = sld [smem:[#allocation19_spill]]  ;;  %s184_s29 = scalar_lea.vmem [#allocation3], %s538_s9 }
  0x2d   : > { %s193_s30 = sshll.u32 %s184_s29, 4  ;;  %p1165_p10 = pnand %p645_p8, %p1087_p3  ;;  %s1161_s30 = int_to_ptr.vmem [resolvable:$true] %s193_s30 }
  0x2e   : > { %p1171_p11 = pnand %p645_p8, %p1123_p12 }
  0x2f   : > { %p767_p5 = pneg %p1165_p10 }
  0x32   : > { %s1159_s10 = scalar_lea.hbm %s1399_s0, %s539_s28  ;;  %s181_s28 = scalar_lea.sflag [#allocation4], %s180_s26 }
  0x33   : > { %s765_s9 = scalar_lea.hbm %s1159_s10, 128  ;;  %s770_s18 = scalar_lea.hbm %s1399_s0, 256 }
  0x34   : > { %p766_p4 = scmp.ne.s32.totalorder %s1159_s10, %s765_s9  ;;  %p771_p12 = scmp.lt.u32.totalorder %s1159_s10, %s1399_s0 }
  0x35   : > { %p772_p8 = scmp.lt.u32.totalorder %s770_s18, %s765_s9  ;;  %p774_p1 = scmp.lt.u32.totalorder %s765_s9, %s1159_s10 }
  0x36   : > { %p768_p3 = pnand %p767_p5, %p766_p4 }
  0x37   : > { %p773_p0 = por %p772_p8, %p771_p12 }
  0x38   : > { %p769_p6 = pneg %p768_p3 }
  0x39   : > { %p775_p9 = por %p774_p1, %p773_p0 }
  0x3b   : > { %p776_p2 = pnand %p775_p9, %p769_p6 }
  0x3d   : > { %779 = shalt.err (!%p776_p2)
}
  0x3e   : > { %s780_s26 = scalar_lea.vmem %s1161_s30, 128  ;;  %s977_s4 = smov [#allocation3]  }
  0x3f   : > { %p781_p4 = scmp.ne.s32.totalorder %s1161_s30, %s780_s26  ;;  %s785_s15 = sshll.u32 %s977_s4, 4  ;;  %s786_s15 = int_to_ptr.vmem [resolvable:$false] %s785_s15 }
  0x40   : > { %s787_s24 = scalar_lea.vmem %s786_s15, 256  ;;  %p788_p7 = scmp.lt.s32.totalorder %s1161_s30, %s786_s15 }
  0x41   : > { %p783_p3 = pnand %p781_p4, %p767_p5  ;;  %p789_p12 = scmp.lt.s32.totalorder %s787_s24, %s780_s26 }
  0x43   : > { %p784_p13 = pneg %p783_p3  ;;  %p790_p8 = por %p789_p12, %p788_p7 }
  0x45   : > { %p791_p0 = pnand %p790_p8, %p784_p13 }
  0x47   : > { %794 = shalt.err (!%p791_p0)
}
  0x48   : > { %637 = dma.hbm_to_vmem [thread:$0]  (!%p1165_p10), %s1159_s10, 128, %s1161_s30, %s181_s28  }
  0x49   : > { %p1402_p2 = scmp.lt.s32.totalorder %s975_s25, 7  ;;  %p1403_p9 = scmp.ge.s32.totalorder %s975_s25, 1 }
  0x4a   : > { %s200_s18 = sand.u32 1, %s943_s17   ;;  %s541_s29 = sshll.u32 %s967_s23, 7 }
  0x4b   : > { %p1206_p1 = pnand %p1403_p9, %p1402_p2  ;;  %s540_s26 = sshll.u32 %s200_s18, 7 }
  0x4c   : > { %s1215_s15 = scalar_lea.hbm %s1371_s1, %s541_s29  ;;  %s204_s24 = scalar_lea.vmem [#allocation6], %s540_s26 }
  0x4d   : > { %s213_s10 = sshll.u32 %s204_s24, 4  ;;  %s1219_s30 = scalar_lea.sflag [#allocation7], %s200_s18  ;;  %s1217_s10 = int_to_ptr.vmem [resolvable:$true] %s213_s10 }
  0x4e   : > { %s795_s28 = scalar_lea.hbm %s1215_s15, 2048  ;;  %p797_p13 = pneg %p1171_p11 }
  0x4f   : > { %p796_p7 = scmp.ne.s32.totalorder %s1215_s15, %s795_s28  ;;  %s800_s5 = scalar_lea.hbm %s1371_s1, 6144 }
  0x50   : > { %p801_p6 = scmp.lt.u32.totalorder %s1215_s15, %s1371_s1  ;;  %p802_p4 = scmp.lt.u32.totalorder %s800_s5, %s795_s28 }
  0x51   : > { %p798_p10 = pnand %p797_p13, %p796_p7  ;;  %p804_p12 = scmp.lt.u32.totalorder %s795_s28, %s1215_s15 }
  0x52   : > { %p803_p3 = por %p802_p4, %p801_p6 }
  0x53   : > { %p799_p5 = pneg %p798_p10 }
  0x54   : > { %p805_p8 = por %p804_p12, %p803_p3 }
  0x56   : > { %p806_p0 = pnand %p805_p8, %p799_p5 }
  0x58   : > { %809 = shalt.err (!%p806_p0)
}
  0x59   : > { %s810_s18 = scalar_lea.vmem %s1217_s10, 2048  ;;  %s978_s26 = smov [#allocation6]  }
  0x5a   : > { %p811_p2 = scmp.ne.s32.totalorder %s1217_s10, %s810_s18  ;;  %s815_s24 = sshll.u32 %s978_s26, 4  ;;  %s816_s24 = int_to_ptr.vmem [resolvable:$false] %s815_s24 }
  0x5b   : > { %s817_s0 = scalar_lea.vmem %s816_s24, 4096  ;;  %p818_p10 = scmp.lt.s32.totalorder %s1217_s10, %s816_s24 }
  0x5c   : > { %p813_p9 = pnand %p811_p2, %p797_p13  ;;  %p819_p6 = scmp.lt.s32.totalorder %s817_s0, %s810_s18 }
  0x5e   : > { %p814_p7 = pneg %p813_p9  ;;  %p820_p4 = por %p819_p6, %p818_p10 }
  0x60   : > { %p821_p3 = pnand %p820_p4, %p814_p7 }
  0x62   : > { %824 = shalt.err (!%p821_p3)
}
  0x63   : > { %s979_s23 = smov 384   ;;  %s980_s28 = smov 128  }
  0x64   : > { %s981_s29 = smov 8   ;;  %231 = sbr.rel (%p1206_p1) target bundleno = 374 (0x176), region = 32 }
  0x65   : > { %640 = dma.hbm_to_vmem [thread:$0]  (!%p1171_p11), %s1215_s15, 2048, %s1217_s10, %s1219_s30, %s979_s23, %s980_s28, %s981_s29  }
  0x66   : > { %s233_s4 = sand.u32 (!%p1206_p1), 1, %s951_s19   ;;  %p1405_p13 = scmp.ne.s32.totalorder (!%p1206_p1), %s1389_s8, 0 }
  0x67   : > { %s1250_s5 = sshll.u32 (!%p1206_p1), %s233_s4, 3  ;;  %s234_s18 = scalar_lea.sflag (!%p1206_p1), [#allocation4], %s233_s4 }
  0x68   : > { %s237_s26 = scalar_lea.vmem (!%p1206_p1), [#allocation3], %s1250_s5 }
  0x6b   : > { %910 = dma.done.wait (%p1405_p13), %s234_s18, 128  }
  0x6c   : > { %912 = vsyncadd (%p1405_p13), %s234_s18, 4294967168  ;;  %s242_s11 = sand.u32 1, %s939_s16   ;;  %p1406_p11 = scmp.ne.s32.totalorder %s1393_s27, 0 }
  0x6d   : > { %s544_s15 = sshll.u32 %s242_s11, 7  ;;  %s243_s10 = scalar_lea.sflag [#allocation7], %s242_s11 }
  0x6e   : > { %s1258_s9 = scalar_lea.vmem [#allocation6], %s544_s15 }
  0x6f   : > { %914 = dma.done.wait (%p1406_p11), %s243_s10, 2048  }
  0x70   : > { %916 = vsyncadd (%p1406_p11), %s243_s10, 4294965248  ;;  %v982_v0 = vmov 0.0|0.0   ;;  %vm983_vm0 = vmmov 0   ;;  %v984_v1 = vmov 0.0   ;;  %v288_v2 = vld [vmem:[%s1258_s9] sm:$0xff]  ;;  %v289_v3 = vld [vmem:[%s1258_s9 + $0x8] sm:$0xff] }
  0x71   : > { %603 = vmatprep.subr.bf16.mxu0 %v982_v0  ;;  %600 = vmatprep.mubr.msk.f32.mxu0 %vm983_vm0, %v984_v1  ;;  %v290_v4 = vld [vmem:[%s1258_s9 + $0x10] sm:$0xff]  ;;  %v604_v5 = vpack.c.bf16 %v289_v3, %v288_v2  ;;  %v291_v6 = vld [vmem:[%s1258_s9 + $0x18] sm:$0xff]  ;;  %v292_v8 = vld [vmem:[%s1258_s9 + $0x20] sm:$0xff]  ;;  %p278_p1 = scmp.lt.s32.totalorder %s959_s21, 2  ;;  %s274_s27 = sand.u32 1, %s927_s13  }
  0x72   : > { %v607_v7 = vpack.c.bf16 %v291_v6, %v290_v4  ;;  %v293_v9 = vld [vmem:[%s1258_s9 + $0x28] sm:$0xff]  ;;  %v294_v11 = vld [vmem:[%s1258_s9 + $0x30] sm:$0xff]  ;;  %v295_v12 = vld [vmem:[%s1258_s9 + $0x38] sm:$0xff]  ;;  %s545_s30 = sshll.u32 %s274_s27, 3  ;;  %s627_s24 = smul.u32 3, %s963_s22 }
  0x73   : > { %605 = vmatpush3.bf16.msra.mxu0 %v604_v5  ;;  %v610_v10 = vpack.c.bf16 %v293_v9, %v292_v8  ;;  %v613_v13 = vpack.c.bf16 %v295_v12, %v294_v11  ;;  %v296_v14 = vld [vmem:[%s1258_s9 + $0x40] sm:$0xff]  ;;  %v297_v15 = vld [vmem:[%s1258_s9 + $0x48] sm:$0xff]  ;;  %v298_v17 = vld [vmem:[%s1258_s9 + $0x50] sm:$0xff]  ;;  %s279_s8 = scalar_select %p278_p1, %s959_s21, 2 }
  0x74   : > { %606 = vmatprep.subr.bf16.mxu0 %v982_v0  ;;  %v616_v16 = vpack.c.bf16 %v297_v15, %v296_v14  ;;  %v299_v18 = vld [vmem:[%s1258_s9 + $0x58] sm:$0xff]  ;;  %v300_v20 = vld [vmem:[%s1258_s9 + $0x60] sm:$0xff]  ;;  %v301_v21 = vld [vmem:[%s1258_s9 + $0x68] sm:$0xff]  ;;  %s403_s29 = sadd.s32 %s959_s21, %s627_s24  ;;  %s276_s18 = scalar_lea.vmem [#allocation8], %s545_s30 }
  0x75   : > { %v619_v19 = vpack.c.bf16 %v299_v18, %v298_v17  ;;  %v622_v22 = vpack.c.bf16 %v301_v21, %v300_v20  ;;  %v302_v23 = vld [vmem:[%s1258_s9 + $0x70] sm:$0xff]  ;;  %v303_v24 = vld [vmem:[%s1258_s9 + $0x78] sm:$0xff]  ;;  %s280_s28 = scalar_lea.vmem %s1372_s2, %s279_s8  ;;  %s548_s4 = sshll.u32 %s403_s29, 7 }
  0x76   : > { %v625_v25 = vpack.c.bf16 %v303_v24, %v302_v23  ;;  %v287_v26 = vld [vmem:[%s237_s26] sm:$0xff]  ;;  %s407_s11 = sshll.u32 %s276_s18, 4  ;;  %s1293_s15 = scalar_lea.hbm %s1373_s3, %s548_s4  ;;  %s1295_s11 = int_to_ptr.vmem [resolvable:$true] %s407_s11 }
  0x77   : > { %608 = vmatpush3.bf16.msra.mxu0 %v607_v7  ;;  %v546_v27 = vld [vmem:[%s280_s28] ss:$0 sm:$0xff]  ;;  %s390_s22 = scalar_lea.sflag [#allocation5], %s274_s27  ;;  %s825_s21 = scalar_lea.vmem %s1295_s11, 128 }
  0x78   : > { %609 = vmatprep.subr.bf16.mxu0 %v982_v0  ;;  %p826_p5 = scmp.ne.s32.totalorder %s1295_s11, %s825_s21  ;;  %p1407_p12 = scmp.ne.s32.totalorder %s1396_s7, 0 }
  0x79   : > { %s985_s10 = smov [#allocation8]  }
  0x7a   : > { %p827_p8 = pnand %p826_p5, %p1407_p12  ;;  %s829_s9 = sshll.u32 %s985_s10, 4  ;;  %s830_s9 = int_to_ptr.vmem [resolvable:$false] %s829_s9 }
  0x7b   : > { %611 = vmatpush3.bf16.msra.mxu0 %v610_v10  ;;  %s831_s8 = scalar_lea.vmem %s830_s9, 256  ;;  %p832_p2 = scmp.lt.s32.totalorder %s1295_s11, %s830_s9 }
  0x7c   : > { %612 = vmatprep.subr.bf16.mxu0 %v982_v0  ;;  %p828_p0 = pneg %p827_p8  ;;  %p833_p9 = scmp.lt.s32.totalorder %s831_s8, %s825_s21 }
  0x7e   : > { %p834_p7 = por %p833_p9, %p832_p2 }
  0x7f   : > { %614 = vmatpush3.bf16.msra.mxu0 %v613_v13 }
  0x80   : > { %615 = vmatprep.subr.bf16.mxu0 %v982_v0  ;;  %p835_p10 = pnand %p834_p7, %p828_p0 }
  0x83   : > { %617 = vmatpush3.bf16.msra.mxu0 %v616_v16 }
  0x84   : > { %618 = vmatprep.subr.bf16.mxu0 %v982_v0 }
  0x87   : > { %620 = vmatpush3.bf16.msra.mxu0 %v619_v19 }
  0x88   : > { %621 = vmatprep.subr.bf16.mxu0 %v982_v0 }
  0x8b   : > { %623 = vmatpush3.bf16.msra.mxu0 %v622_v22 }
  0x8c   : > { %624 = vmatprep.subr.bf16.mxu0 %v982_v0 }
  0x8f   : > { %626 = vmatpush3.bf16.msra.mxu0 %v625_v25 }
  0x92   : > { %601 = vmatmul.mubr.f32.vlgmr.msra.gmra.mrb[0].mxu0 %v287_v26 }
 0x165   : > { %v370_v28 = vpop.f32.mrb[0].mxu0 }
 0x166   : > { %v387_v29 = vadd.f32 %v546_v27, %v370_v28  ;;  %v602_v30 = vpop.f32.mrb[1].mxu0 }
 0x168   : > { %388 = vst [vmem:[%s276_s18] sm:$0xff] %v387_v29 }
 0x169   : > { %838 = shalt.err (!%p835_p10)
}
 0x16a   : > { %s839_s27 = scalar_lea.hbm %s1293_s15, 128  ;;  %s843_s0 = scalar_lea.hbm %s1373_s3, 768 }
 0x16b   : > { %p840_p6 = scmp.ne.s32.totalorder %s1293_s15, %s839_s27  ;;  %p844_p13 = scmp.lt.u32.totalorder %s1293_s15, %s1373_s3 }
 0x16c   : > { %p845_p11 = scmp.lt.u32.totalorder %s843_s0, %s839_s27  ;;  %p847_p5 = scmp.lt.u32.totalorder %s839_s27, %s1293_s15 }
 0x16d   : > { %p841_p4 = pnand %p840_p6, %p1407_p12 }
 0x16e   : > { %p846_p1 = por %p845_p11, %p844_p13 }
 0x16f   : > { %p842_p3 = pneg %p841_p4 }
 0x170   : > { %p848_p8 = por %p847_p5, %p846_p1 }
 0x172   : > { %p849_p0 = pnand %p848_p8, %p842_p3 }
 0x174   : > { %852 = shalt.err (!%p849_p0)
}
 0x175   : > { %632 = dma.vmem_to_hbm [thread:$0]  (%p1407_p12), %s1295_s11, 128, %s1293_s15, %s390_s22  }
 0x176 PF: > { %p646_p2 = scmp.ge.s32.totalorder %s975_s25, 2  ;;  %s419_s29 = sand.u32 1, %s923_s12  }
 0x177   : > { %p1408_p9 = scmp.ne.s32.totalorder %s1398_s6, 0  ;;  %s420_s4 = scalar_lea.sflag [#allocation5], %s419_s29 }
 0x179   : > { %p642_p7 = pnand %p646_p2, %p1408_p9 }
 0x17b   : > { %918 = dma.done.wait (!%p642_p7), %s420_s4, 128  }
 0x17c   : > { %920 = vsyncadd (!%p642_p7), %s420_s4, 4294967168  ;;  %s22_s25 = sadd.s32 1, %s975_s25   ;;  %s1410_s7 = sld [smem:[#allocation18_spill]] }
 0x17d   : > { %p1323_p10 = scmp.ge.s32.totalorder %s22_s25, 8   ;;  %s1411_s11 = sld [smem:[#allocation16_spill]] }
 0x17e   : > { %s1412_s5 = sld [smem:[#allocation17_spill]]  ;;  %s1413_s21 = sld [smem:[#allocation12_spill]] }
 0x17f   : > { %s1414_s22 = sld [smem:[#allocation13_spill]]  ;;  %s1415_s23 = sld [smem:[#allocation14_spill]] }
 0x180   : > { %s1416_s24 = sld [smem:[#allocation15_spill]]  ;;  %s1418_s12 = smov %s927_s13 }
 0x181   : > { %s1419_s13 = smov %s931_s14  ;;  %s1421_s15 = smov %s939_s16 }
 0x182   : > { %s1420_s14 = smov %s1410_s7  ;;  %s1422_s16 = smov %s943_s17 }
 0x183   : > { %s1423_s17 = smov %s1411_s11  ;;  %s1424_s18 = smov %s951_s19 }
 0x184   : > { %s1425_s19 = smov %s955_s20  ;;  %s1426_s20 = smov %s1412_s5 }
 0x185   :  { %21 = sbr.rel (!%p1323_p10) target bundleno = 14 (0xe), region = 101 }
 0x18c   :  { %425 = vsyncpa [#allocation4], 1 }
 0x18d   :  { %427 = vsyncpa [#allocation4 + $0x1], 1 }
 0x18e   :  { %428 = vsyncpa [#allocation7], 1 }
 0x18f   :  { %430 = vsyncpa [#allocation7 + $0x1], 1 }
 0x190   :  { %431 = vsyncpa [#allocation5], 1 }
 0x191   :  { %433 = vsyncpa [#allocation5 + $0x1], 1 }

</bundles_post_ra>
